<compile_context>
chip_gen: v7x
topology: tpu7x:2x2x1
jax: 0.10.0
libtpu: 0.0.40
codegen_flags: <defaults>
</compile_context>

<pallas_src>
import jax
import jax.numpy as jnp
from jax import lax
from jax.experimental import pallas as pl
from jax.experimental.pallas import tpu as pltpu


# --------------------------------------------------------------------------
# Host-side weight packing
# --------------------------------------------------------------------------
def _banded_conv_weights(wt, W):
    """Fold a 3x3 HWIO conv kernel into 3 banded (row-Toeplitz) matrices.

    wt : (3, 3, Cin, Cout)
    returns (3, (W+2)*Cin, W*Cout) -- one matrix per ky row; the kx offset is
    absorbed into the row index, so  conv = sum_ky  padded_rows_ky @ mat_ky.
    """
    _, _, cin, cout = wt.shape
    Wp = W + 2
    idx = jnp.arange(W)
    mats = []
    for dy in range(3):
        b4 = jnp.zeros((Wp, cin, W, cout), jnp.float32)
        for dx in range(3):
            # padded width column (w + dx) feeds output column w
            b4 = b4.at[idx + dx, :, idx, :].set(wt[dy, dx])
        mats.append(b4.reshape(Wp * cin, W * cout))
    return jnp.stack(mats)


def _blockdiag_1x1(wo, W):
    """(Cin, Cout) 1x1 conv -> block-diagonal (W*Cin, W*Cout) matrix."""
    cin, cout = wo.shape
    idx = jnp.arange(W)
    b4 = jnp.zeros((W, cin, W, cout), jnp.float32)
    b4 = b4.at[idx, :, idx, :].set(wo)
    return b4.reshape(W * cin, W * cout)


# --------------------------------------------------------------------------
# Pallas kernel + wrapper
# --------------------------------------------------------------------------
def densecat_cat_diff_nhwc(x, y, params):
    """x, y: (N, H, W, C) float32 NHWC. Returns (N, H, W, Cout) NHWC."""
    w1, b1, w2, b2, w3, b3, wo, bo = params
    N, H, W, C = x.shape
    Cout = wo.shape[-1]
    Hp, Wp = H + 2, W + 2
    WC, WpC, WCo = W * C, Wp * C, W * Cout

    # banded 3x3 weights for conv1/2/3 (bf16 MXU operands) and lane-tiled biases
    w_all = jnp.concatenate(
        [_banded_conv_weights(w1, W),
         _banded_conv_weights(w2, W),
         _banded_conv_weights(w3, W)], axis=0).astype(jnp.bfloat16)       # (9, WpC, WC)
    b_all = jnp.stack(
        [jnp.tile(b1, W), jnp.tile(b2, W), jnp.tile(b3, W)])[:, None, :]  # (3, 1, WC) f32
    wo_blk = _blockdiag_1x1(wo, W).astype(jnp.bfloat16)                   # (WC, WCo)
    bo_lane = jnp.tile(bo, W).reshape(1, WCo)                             # (1, WCo) f32

    # lane-packed inputs: (N, H, W*C) is a free row-major reshape of NHWC
    x_p = x.reshape(N, H, WC)
    y_p = y.reshape(N, H, WC)

    def kernel(x_ref, y_ref, w_ref, b_ref, wo_ref, bo_ref, o_ref, pad_ref):
        # pad_ref: (2, Hp, Wp*C) f32 scratch, branch 0 = x, branch 1 = y.
        # Clear only the zero border every step (interior is always fully
        # rewritten before each read; safe under megacore grid splitting).
        zrow = jnp.zeros((2, 1, WpC), jnp.float32)
        zcol = jnp.zeros((2, Hp, C), jnp.float32)
        pad_ref[:, 0:1, :] = zrow
        pad_ref[:, Hp - 1:Hp, :] = zrow
        pad_ref[:, :, 0:C] = zcol
        pad_ref[:, :, WpC - C:WpC] = zcol

        # write the (unpadded) inputs into the scratch interior
        pad_ref[0:1, 1:H + 1, C:C + WC] = x_ref[...]
        pad_ref[1:2, 1:H + 1, C:C + WC] = y_ref[...]

        def conv3x3_relu(layer):
            # one (2H, WpC) x (WpC, WC) bf16 matmul per ky row, f32 accumulate
            acc = None
            for dy in range(3):
                a = pad_ref[:, dy:dy + H, :].reshape(2 * H, WpC)
                z = jnp.dot(a.astype(jnp.bfloat16), w_ref[3 * layer + dy],
                            preferred_element_type=jnp.float32)
                acc = z if acc is None else acc + z
            return jnp.maximum(acc + b_ref[layer], 0.0)        # (2H, WC) f32

        def repad(s):  # write both branches back into the scratch interior
            pad_ref[:, 1:H + 1, C:C + WC] = s.reshape(2, H, WC)

        s = conv3x3_relu(0)            # a1              (x rows | y rows)
        repad(s)
        s = s + conv3x3_relu(1)        # a1 + a2  (== conv3 input)
        repad(s)
        s = s + conv3x3_relu(2)        # a1 + a2 + a3

        d = jnp.abs(s[:H] - s[H:])     # (H, W*C) f32
        out = jnp.dot(d.astype(jnp.bfloat16), wo_ref[...],
                      preferred_element_type=jnp.float32)
        out = jnp.maximum(out + bo_ref[...], 0.0)              # (H, W*Cout) lane-dense
        o_ref[...] = out.reshape(1, H, WCo)

    def full(shape):
        n = len(shape)
        return pl.BlockSpec(shape, lambda b, _n=n: (0,) * _n)

    flops = int(N * (9 * 2 * (2 * H) * WpC * WC + 2 * H * WC * WCo))
    bytes_accessed = int(4 * 2 * N * H * WC
                         + 2 * (9 * WpC * WC + WC * WCo)
                         + 4 * (3 * WC + WCo)
                         + 4 * N * H * WCo)
    cost = pl.CostEstimate(flops=flops, transcendentals=0,
                           bytes_accessed=bytes_accessed)

    out_p = pl.pallas_call(
        kernel,
        out_shape=jax.ShapeDtypeStruct((N, H, WCo), jnp.float32),
        grid_spec=pltpu.PrefetchScalarGridSpec(
            num_scalar_prefetch=0,
            grid=(N,),
            in_specs=[
                pl.BlockSpec((1, H, WC), lambda b: (b, 0, 0)),   # x (lane-packed)
                pl.BlockSpec((1, H, WC), lambda b: (b, 0, 0)),   # y (lane-packed)
                full((9, WpC, WC)),                              # conv1-3 banded weights
                full((3, 1, WC)),                                # conv biases (lane-tiled)
                full((WC, WCo)),                                 # 1x1+BN block-diag weight
                full((1, WCo)),                                  # 1x1+BN bias (lane-tiled)
            ],
            out_specs=pl.BlockSpec((1, H, WCo), lambda b: (b, 0, 0)),
            scratch_shapes=[pltpu.VMEM((2, Hp, WpC), jnp.float32)],
        ),
        compiler_params=pltpu.CompilerParams(
            dimension_semantics=("parallel",)),
        cost_estimate=cost,
    )(x_p, y_p, w_all, b_all, wo_blk, bo_lane)

    return out_p.reshape(N, H, W, Cout)


def densecat_cat_diff_nchw(x_nchw, y_nchw, params):
    """PyTorch-compatible interface: x, y in NCHW; returns NCHW."""
    x = jnp.transpose(x_nchw, (0, 2, 3, 1))
    y = jnp.transpose(y_nchw, (0, 2, 3, 1))
    out = densecat_cat_diff_nhwc(x, y, params)
    return jnp.transpose(out, (0, 3, 1, 2))


# --------------------------------------------------------------------------
# Reference, parameters, test
# --------------------------------------------------------------------------
def ref_forward_nhwc(x, y, params):
    """Pure-JAX reference (lax conv) for correctness checking."""
    w1, b1, w2, b2, w3, b3, wo, bo = params
    dn = lax.conv_dimension_numbers(x.shape, w1.shape, ('NHWC', 'HWIO', 'NHWC'))

    def c3(inp, w, b):
        o = lax.conv_general_dilated(inp, w, (1, 1), 'SAME',
                                     dimension_numbers=dn)
        return jax.nn.relu(o + b)

    x1 = c3(x, w1, b1); x2 = c3(x1, w2, b2); x3 = c3(x2 + x1, w3, b3)
    y1 = c3(y, w1, b1); y2 = c3(y1, w2, b2); y3 = c3(y2 + y1, w3, b3)
    d = jnp.abs(x1 + x2 + x3 - y1 - y2 - y3)
    return jax.nn.relu(jnp.einsum('nhwc,cd->nhwd', d, wo) + bo)


def make_params(key, in_chn, out_chn):
    """PyTorch-like uniform fan-in init; eval-mode BatchNorm (default stats)
    folded into the 1x1 conv."""
    ks = jax.random.split(key, 8)

    def uni(k, shape, fan_in):
        bound = 1.0 / jnp.sqrt(jnp.float32(fan_in))
        return jax.random.uniform(k, shape, jnp.float32, -bound, bound)

    fan3 = 9 * in_chn
    w1 = uni(ks[0], (3, 3, in_chn, in_chn), fan3)
    b1 = uni(ks[1], (in_chn,), fan3)
    w2 = uni(ks[2], (3, 3, in_chn, in_chn), fan3)
    b2 = uni(ks[3], (in_chn,), fan3)
    w3 = uni(ks[4], (3, 3, in_chn, in_chn), fan3)
    b3 = uni(ks[5], (in_chn,), fan3)
    wo = uni(ks[6], (in_chn, out_chn), in_chn)
    bo = uni(ks[7], (out_chn,), in_chn)

    gamma = jnp.ones((out_chn,), jnp.float32)
    beta = jnp.zeros((out_chn,), jnp.float32)
    mean = jnp.zeros((out_chn,), jnp.float32)
    var = jnp.ones((out_chn,), jnp.float32)
    eps = 1e-5
    scale = gamma / jnp.sqrt(var + eps)
    wo_f = wo * scale[None, :]
    bo_f = (bo - mean) * scale + beta
    return (w1, b1, w2, b2, w3, b3, wo_f, bo_f)


def quantize_matmul_weights(params):
    """Round matmul weights to bf16-representable values so the f32 reference
    and the bf16-MXU kernel share identical effective weights."""
    w1, b1, w2, b2, w3, b3, wo, bo = params
    q = lambda w: w.astype(jnp.bfloat16).astype(jnp.float32)
    return (q(w1), b1, q(w2), b2, q(w3), b3, q(wo), bo)


if __name__ == "__main__":
    N, C, H, W = 2, 4, 16, 16
    Cout = 8

    key = jax.random.PRNGKey(0)
    kx, ky, kp = jax.random.split(key, 3)
    x_nchw = jax.random.normal(kx, (N, C, H, W), jnp.float32)
    y_nchw = jax.random.normal(ky, (N, C, H, W), jnp.float32)
    params = quantize_matmul_weights(make_params(kp, C, Cout))

    out = densecat_cat_diff_nchw(x_nchw, y_nchw, params)
    out = jax.block_until_ready(out)

    # correctness check against a pure-JAX reference (activations go through
    # bf16 MXU operands in the kernel, hence the relaxed tolerance)
    x_nhwc = jnp.transpose(x_nchw, (0, 2, 3, 1))
    y_nhwc = jnp.transpose(y_nchw, (0, 2, 3, 1))
    ref = jnp.transpose(ref_forward_nhwc(x_nhwc, y_nhwc, params), (0, 3, 1, 2))
    assert out.shape == (N, Cout, H, W)
    assert jnp.allclose(out, ref, rtol=5e-2, atol=5e-2), (
        float(jnp.max(jnp.abs(out - ref))))

    print("KERNEL_OK")
</pallas_src>

<mosaic_0001>
module attributes {stable_mosaic.version = 11 : i64} {
  func.func @kernel(%arg0: i32, %arg1: memref<1x16x64xf32, #tpu.memory_space<vmem>>, %arg2: memref<1x16x64xf32, #tpu.memory_space<vmem>>, %arg3: memref<9x72x64xbf16, #tpu.memory_space<vmem>>, %arg4: memref<3x1x64xf32, #tpu.memory_space<vmem>>, %arg5: memref<64x128xbf16, #tpu.memory_space<vmem>>, %arg6: memref<1x128xf32, #tpu.memory_space<vmem>>, %arg7: memref<1x16x128xf32, #tpu.memory_space<vmem>>, %arg8: memref<2x18x72xf32, #tpu.memory_space<vmem>>) attributes {dimension_semantics = [#tpu.dimension_semantics<parallel>], iteration_bounds = array<i64: 2>, scalar_prefetch = 0 : i64, scratch_operands = 1 : i64, tpu.core_type = #tpu.core_type<tc>, window_params = [{transform_indices = @transform_0, window_bounds = array<i64: 1, 16, 64>}, {transform_indices = @transform_1, window_bounds = array<i64: 1, 16, 64>}, {pipeline_mode = #tpu.pipeline_mode<synchronous>, transform_indices = @transform_2, window_bounds = array<i64: 9, 72, 64>}, {pipeline_mode = #tpu.pipeline_mode<synchronous>, transform_indices = @transform_3, window_bounds = array<i64: 3, 1, 64>}, {pipeline_mode = #tpu.pipeline_mode<synchronous>, transform_indices = @transform_4, window_bounds = array<i64: 64, 128>}, {pipeline_mode = #tpu.pipeline_mode<synchronous>, transform_indices = @transform_5, window_bounds = array<i64: 1, 128>}, {transform_indices = @transform_6, window_bounds = array<i64: 1, 16, 128>}]} {
    %cst = arith.constant 0.000000e+00 : f32
    %0 = vector.broadcast %cst : f32 to vector<2x1x72xf32>
    %cst_0 = arith.constant 0.000000e+00 : f32
    %1 = vector.broadcast %cst_0 : f32 to vector<2x18x4xf32>
    %c0 = arith.constant 0 : index
    %c0_1 = arith.constant 0 : index
    %c0_2 = arith.constant 0 : index
    %2 = vector.load %arg8[%c0, %c0_1, %c0_2] : memref<2x18x72xf32, #tpu.memory_space<vmem>>, vector<2x1x72xf32>
    tpu.vector_store %arg8[%c0, %c0_1, %c0_2], %0 {strides = array<i32>} : memref<2x18x72xf32, #tpu.memory_space<vmem>>, vector<2x1x72xf32>,
    %c0_3 = arith.constant 0 : index
    %c17 = arith.constant 17 : index
    %c0_4 = arith.constant 0 : index
    %3 = vector.load %arg8[%c0_3, %c17, %c0_4] : memref<2x18x72xf32, #tpu.memory_space<vmem>>, vector<2x1x72xf32>
    tpu.vector_store %arg8[%c0_3, %c17, %c0_4], %0 {strides = array<i32>} : memref<2x18x72xf32, #tpu.memory_space<vmem>>, vector<2x1x72xf32>,
    %c0_5 = arith.constant 0 : index
    %c0_6 = arith.constant 0 : index
    %c0_7 = arith.constant 0 : index
    %4 = vector.load %arg8[%c0_5, %c0_6, %c0_7] : memref<2x18x72xf32, #tpu.memory_space<vmem>>, vector<2x18x4xf32>
    tpu.vector_store %arg8[%c0_5, %c0_6, %c0_7], %1 {strides = array<i32>} : memref<2x18x72xf32, #tpu.memory_space<vmem>>, vector<2x18x4xf32>,
    %c0_8 = arith.constant 0 : index
    %c0_9 = arith.constant 0 : index
    %c68 = arith.constant 68 : index
    %5 = vector.load %arg8[%c0_8, %c0_9, %c68] : memref<2x18x72xf32, #tpu.memory_space<vmem>>, vector<2x18x4xf32>
    tpu.vector_store %arg8[%c0_8, %c0_9, %c68], %1 {strides = array<i32>} : memref<2x18x72xf32, #tpu.memory_space<vmem>>, vector<2x18x4xf32>,
    %c0_10 = arith.constant 0 : index
    %c0_11 = arith.constant 0 : index
    %c0_12 = arith.constant 0 : index
    %6 = vector.load %arg1[%c0_10, %c0_11, %c0_12] : memref<1x16x64xf32, #tpu.memory_space<vmem>>, vector<1x16x64xf32>
    %c0_13 = arith.constant 0 : index
    %c1 = arith.constant 1 : index
    %c4 = arith.constant 4 : index
    %7 = vector.load %arg8[%c0_13, %c1, %c4] : memref<2x18x72xf32, #tpu.memory_space<vmem>>, vector<1x16x64xf32>
    tpu.vector_store %arg8[%c0_13, %c1, %c4], %6 {strides = array<i32>} : memref<2x18x72xf32, #tpu.memory_space<vmem>>, vector<1x16x64xf32>,
    %c0_14 = arith.constant 0 : index
    %c0_15 = arith.constant 0 : index
    %c0_16 = arith.constant 0 : index
    %8 = vector.load %arg2[%c0_14, %c0_15, %c0_16] : memref<1x16x64xf32, #tpu.memory_space<vmem>>, vector<1x16x64xf32>
    %c1_17 = arith.constant 1 : index
    %c1_18 = arith.constant 1 : index
    %c4_19 = arith.constant 4 : index
    %9 = vector.load %arg8[%c1_17, %c1_18, %c4_19] : memref<2x18x72xf32, #tpu.memory_space<vmem>>, vector<1x16x64xf32>
    tpu.vector_store %arg8[%c1_17, %c1_18, %c4_19], %8 {strides = array<i32>} : memref<2x18x72xf32, #tpu.memory_space<vmem>>, vector<1x16x64xf32>,
    %c0_20 = arith.constant 0 : index
    %c0_21 = arith.constant 0 : index
    %c0_22 = arith.constant 0 : index
    %10 = vector.load %arg8[%c0_20, %c0_21, %c0_22] : memref<2x18x72xf32, #tpu.memory_space<vmem>>, vector<2x16x72xf32>
    %11 = vector.shape_cast %10 : vector<2x16x72xf32> to vector<32x72xf32>
    %12 = arith.truncf %11 : vector<32x72xf32> to vector<32x72xbf16>
    %c0_23 = arith.constant 0 : index
    %c0_24 = arith.constant 0 : index
    %c0_25 = arith.constant 0 : index
    %13 = vector.load %arg3[%c0_23, %c0_24, %c0_25] : memref<9x72x64xbf16, #tpu.memory_space<vmem>>, vector<1x72x64xbf16>
    %14 = vector.shape_cast %13 : vector<1x72x64xbf16> to vector<72x64xbf16>
    %cst_26 = arith.constant dense<0.000000e+00> : vector<32x64xf32>
    %15 = tpu.matmul %12, %14, %cst_26 {dimension_numbers = #tpu.dot_dimension_numbers<[1], [0], [0], [1], [0, 0, 1, 1], [], []>} : vector<32x72xbf16>, vector<72x64xbf16>, vector<32x64xf32> -> vector<32x64xf32>
    %c0_27 = arith.constant 0 : index
    %c1_28 = arith.constant 1 : index
    %c0_29 = arith.constant 0 : index
    %16 = vector.load %arg8[%c0_27, %c1_28, %c0_29] : memref<2x18x72xf32, #tpu.memory_space<vmem>>, vector<2x16x72xf32>
    %17 = vector.shape_cast %16 : vector<2x16x72xf32> to vector<32x72xf32>
    %18 = arith.truncf %17 : vector<32x72xf32> to vector<32x72xbf16>
    %c1_30 = arith.constant 1 : index
    %c0_31 = arith.constant 0 : index
    %c0_32 = arith.constant 0 : index
    %19 = vector.load %arg3[%c1_30, %c0_31, %c0_32] : memref<9x72x64xbf16, #tpu.memory_space<vmem>>, vector<1x72x64xbf16>
    %20 = vector.shape_cast %19 : vector<1x72x64xbf16> to vector<72x64xbf16>
    %cst_33 = arith.constant dense<0.000000e+00> : vector<32x64xf32>
    %21 = tpu.matmul %18, %20, %cst_33 {dimension_numbers = #tpu.dot_dimension_numbers<[1], [0], [0], [1], [0, 0, 1, 1], [], []>} : vector<32x72xbf16>, vector<72x64xbf16>, vector<32x64xf32> -> vector<32x64xf32>
    %22 = arith.addf %15, %21 : vector<32x64xf32>
    %c0_34 = arith.constant 0 : index
    %c2 = arith.constant 2 : index
    %c0_35 = arith.constant 0 : index
    %23 = vector.load %arg8[%c0_34, %c2, %c0_35] : memref<2x18x72xf32, #tpu.memory_space<vmem>>, vector<2x16x72xf32>
    %24 = vector.shape_cast %23 : vector<2x16x72xf32> to vector<32x72xf32>
    %25 = arith.truncf %24 : vector<32x72xf32> to vector<32x72xbf16>
    %c2_36 = arith.constant 2 : index
    %c0_37 = arith.constant 0 : index
    %c0_38 = arith.constant 0 : index
    %26 = vector.load %arg3[%c2_36, %c0_37, %c0_38] : memref<9x72x64xbf16, #tpu.memory_space<vmem>>, vector<1x72x64xbf16>
    %27 = vector.shape_cast %26 : vector<1x72x64xbf16> to vector<72x64xbf16>
    %cst_39 = arith.constant dense<0.000000e+00> : vector<32x64xf32>
    %28 = tpu.matmul %25, %27, %cst_39 {dimension_numbers = #tpu.dot_dimension_numbers<[1], [0], [0], [1], [0, 0, 1, 1], [], []>} : vector<32x72xbf16>, vector<72x64xbf16>, vector<32x64xf32> -> vector<32x64xf32>
    %29 = arith.addf %22, %28 : vector<32x64xf32>
    %c0_40 = arith.constant 0 : index
    %c0_41 = arith.constant 0 : index
    %c0_42 = arith.constant 0 : index
    %30 = vector.load %arg4[%c0_40, %c0_41, %c0_42] : memref<3x1x64xf32, #tpu.memory_space<vmem>>, vector<1x1x64xf32>
    %31 = vector.shape_cast %30 : vector<1x1x64xf32> to vector<1x64xf32>
    %32 = vector.broadcast %31 : vector<1x64xf32> to vector<32x64xf32>
    %33 = arith.addf %29, %32 : vector<32x64xf32>
    %cst_43 = arith.constant 0.000000e+00 : f32
    %34 = vector.broadcast %cst_43 : f32 to vector<32x64xf32>
    %35 = arith.maximumf %33, %34 : vector<32x64xf32>
    %36 = vector.shape_cast %35 : vector<32x64xf32> to vector<2x16x64xf32>
    %c0_44 = arith.constant 0 : index
    %c1_45 = arith.constant 1 : index
    %c4_46 = arith.constant 4 : index
    %37 = vector.load %arg8[%c0_44, %c1_45, %c4_46] : memref<2x18x72xf32, #tpu.memory_space<vmem>>, vector<2x16x64xf32>
    tpu.vector_store %arg8[%c0_44, %c1_45, %c4_46], %36 {strides = array<i32>} : memref<2x18x72xf32, #tpu.memory_space<vmem>>, vector<2x16x64xf32>,
    %c0_47 = arith.constant 0 : index
    %c0_48 = arith.constant 0 : index
    %c0_49 = arith.constant 0 : index
    %38 = vector.load %arg8[%c0_47, %c0_48, %c0_49] : memref<2x18x72xf32, #tpu.memory_space<vmem>>, vector<2x16x72xf32>
    %39 = vector.shape_cast %38 : vector<2x16x72xf32> to vector<32x72xf32>
    %40 = arith.truncf %39 : vector<32x72xf32> to vector<32x72xbf16>
    %c3 = arith.constant 3 : index
    %c0_50 = arith.constant 0 : index
    %c0_51 = arith.constant 0 : index
    %41 = vector.load %arg3[%c3, %c0_50, %c0_51] : memref<9x72x64xbf16, #tpu.memory_space<vmem>>, vector<1x72x64xbf16>
    %42 = vector.shape_cast %41 : vector<1x72x64xbf16> to vector<72x64xbf16>
    %cst_52 = arith.constant dense<0.000000e+00> : vector<32x64xf32>
    %43 = tpu.matmul %40, %42, %cst_52 {dimension_numbers = #tpu.dot_dimension_numbers<[1], [0], [0], [1], [0, 0, 1, 1], [], []>} : vector<32x72xbf16>, vector<72x64xbf16>, vector<32x64xf32> -> vector<32x64xf32>
    %c0_53 = arith.constant 0 : index
    %c1_54 = arith.constant 1 : index
    %c0_55 = arith.constant 0 : index
    %44 = vector.load %arg8[%c0_53, %c1_54, %c0_55] : memref<2x18x72xf32, #tpu.memory_space<vmem>>, vector<2x16x72xf32>
    %45 = vector.shape_cast %44 : vector<2x16x72xf32> to vector<32x72xf32>
    %46 = arith.truncf %45 : vector<32x72xf32> to vector<32x72xbf16>
    %c4_56 = arith.constant 4 : index
    %c0_57 = arith.constant 0 : index
    %c0_58 = arith.constant 0 : index
    %47 = vector.load %arg3[%c4_56, %c0_57, %c0_58] : memref<9x72x64xbf16, #tpu.memory_space<vmem>>, vector<1x72x64xbf16>
    %48 = vector.shape_cast %47 : vector<1x72x64xbf16> to vector<72x64xbf16>
    %cst_59 = arith.constant dense<0.000000e+00> : vector<32x64xf32>
    %49 = tpu.matmul %46, %48, %cst_59 {dimension_numbers = #tpu.dot_dimension_numbers<[1], [0], [0], [1], [0, 0, 1, 1], [], []>} : vector<32x72xbf16>, vector<72x64xbf16>, vector<32x64xf32> -> vector<32x64xf32>
    %50 = arith.addf %43, %49 : vector<32x64xf32>
    %c0_60 = arith.constant 0 : index
    %c2_61 = arith.constant 2 : index
    %c0_62 = arith.constant 0 : index
    %51 = vector.load %arg8[%c0_60, %c2_61, %c0_62] : memref<2x18x72xf32, #tpu.memory_space<vmem>>, vector<2x16x72xf32>
    %52 = vector.shape_cast %51 : vector<2x16x72xf32> to vector<32x72xf32>
    %53 = arith.truncf %52 : vector<32x72xf32> to vector<32x72xbf16>
    %c5 = arith.constant 5 : index
    %c0_63 = arith.constant 0 : index
    %c0_64 = arith.constant 0 : index
    %54 = vector.load %arg3[%c5, %c0_63, %c0_64] : memref<9x72x64xbf16, #tpu.memory_space<vmem>>, vector<1x72x64xbf16>
    %55 = vector.shape_cast %54 : vector<1x72x64xbf16> to vector<72x64xbf16>
    %cst_65 = arith.constant dense<0.000000e+00> : vector<32x64xf32>
    %56 = tpu.matmul %53, %55, %cst_65 {dimension_numbers = #tpu.dot_dimension_numbers<[1], [0], [0], [1], [0, 0, 1, 1], [], []>} : vector<32x72xbf16>, vector<72x64xbf16>, vector<32x64xf32> -> vector<32x64xf32>
    %57 = arith.addf %50, %56 : vector<32x64xf32>
    %c1_66 = arith.constant 1 : index
    %c0_67 = arith.constant 0 : index
    %c0_68 = arith.constant 0 : index
    %58 = vector.load %arg4[%c1_66, %c0_67, %c0_68] : memref<3x1x64xf32, #tpu.memory_space<vmem>>, vector<1x1x64xf32>
    %59 = vector.shape_cast %58 : vector<1x1x64xf32> to vector<1x64xf32>
    %60 = vector.broadcast %59 : vector<1x64xf32> to vector<32x64xf32>
    %61 = arith.addf %57, %60 : vector<32x64xf32>
    %cst_69 = arith.constant 0.000000e+00 : f32
    %62 = vector.broadcast %cst_69 : f32 to vector<32x64xf32>
    %63 = arith.maximumf %61, %62 : vector<32x64xf32>
    %64 = arith.addf %35, %63 : vector<32x64xf32>
    %65 = vector.shape_cast %64 : vector<32x64xf32> to vector<2x16x64xf32>
    %c0_70 = arith.constant 0 : index
    %c1_71 = arith.constant 1 : index
    %c4_72 = arith.constant 4 : index
    %66 = vector.load %arg8[%c0_70, %c1_71, %c4_72] : memref<2x18x72xf32, #tpu.memory_space<vmem>>, vector<2x16x64xf32>
    tpu.vector_store %arg8[%c0_70, %c1_71, %c4_72], %65 {strides = array<i32>} : memref<2x18x72xf32, #tpu.memory_space<vmem>>, vector<2x16x64xf32>,
    %c0_73 = arith.constant 0 : index
    %c0_74 = arith.constant 0 : index
    %c0_75 = arith.constant 0 : index
    %67 = vector.load %arg8[%c0_73, %c0_74, %c0_75] : memref<2x18x72xf32, #tpu.memory_space<vmem>>, vector<2x16x72xf32>
    %68 = vector.shape_cast %67 : vector<2x16x72xf32> to vector<32x72xf32>
    %69 = arith.truncf %68 : vector<32x72xf32> to vector<32x72xbf16>
    %c6 = arith.constant 6 : index
    %c0_76 = arith.constant 0 : index
    %c0_77 = arith.constant 0 : index
    %70 = vector.load %arg3[%c6, %c0_76, %c0_77] : memref<9x72x64xbf16, #tpu.memory_space<vmem>>, vector<1x72x64xbf16>
    %71 = vector.shape_cast %70 : vector<1x72x64xbf16> to vector<72x64xbf16>
    %cst_78 = arith.constant dense<0.000000e+00> : vector<32x64xf32>
    %72 = tpu.matmul %69, %71, %cst_78 {dimension_numbers = #tpu.dot_dimension_numbers<[1], [0], [0], [1], [0, 0, 1, 1], [], []>} : vector<32x72xbf16>, vector<72x64xbf16>, vector<32x64xf32> -> vector<32x64xf32>
    %c0_79 = arith.constant 0 : index
    %c1_80 = arith.constant 1 : index
    %c0_81 = arith.constant 0 : index
    %73 = vector.load %arg8[%c0_79, %c1_80, %c0_81] : memref<2x18x72xf32, #tpu.memory_space<vmem>>, vector<2x16x72xf32>
    %74 = vector.shape_cast %73 : vector<2x16x72xf32> to vector<32x72xf32>
    %75 = arith.truncf %74 : vector<32x72xf32> to vector<32x72xbf16>
    %c7 = arith.constant 7 : index
    %c0_82 = arith.constant 0 : index
    %c0_83 = arith.constant 0 : index
    %76 = vector.load %arg3[%c7, %c0_82, %c0_83] : memref<9x72x64xbf16, #tpu.memory_space<vmem>>, vector<1x72x64xbf16>
    %77 = vector.shape_cast %76 : vector<1x72x64xbf16> to vector<72x64xbf16>
    %cst_84 = arith.constant dense<0.000000e+00> : vector<32x64xf32>
    %78 = tpu.matmul %75, %77, %cst_84 {dimension_numbers = #tpu.dot_dimension_numbers<[1], [0], [0], [1], [0, 0, 1, 1], [], []>} : vector<32x72xbf16>, vector<72x64xbf16>, vector<32x64xf32> -> vector<32x64xf32>
    %79 = arith.addf %72, %78 : vector<32x64xf32>
    %c0_85 = arith.constant 0 : index
    %c2_86 = arith.constant 2 : index
    %c0_87 = arith.constant 0 : index
    %80 = vector.load %arg8[%c0_85, %c2_86, %c0_87] : memref<2x18x72xf32, #tpu.memory_space<vmem>>, vector<2x16x72xf32>
    %81 = vector.shape_cast %80 : vector<2x16x72xf32> to vector<32x72xf32>
    %82 = arith.truncf %81 : vector<32x72xf32> to vector<32x72xbf16>
    %c8 = arith.constant 8 : index
    %c0_88 = arith.constant 0 : index
    %c0_89 = arith.constant 0 : index
    %83 = vector.load %arg3[%c8, %c0_88, %c0_89] : memref<9x72x64xbf16, #tpu.memory_space<vmem>>, vector<1x72x64xbf16>
    %84 = vector.shape_cast %83 : vector<1x72x64xbf16> to vector<72x64xbf16>
    %cst_90 = arith.constant dense<0.000000e+00> : vector<32x64xf32>
    %85 = tpu.matmul %82, %84, %cst_90 {dimension_numbers = #tpu.dot_dimension_numbers<[1], [0], [0], [1], [0, 0, 1, 1], [], []>} : vector<32x72xbf16>, vector<72x64xbf16>, vector<32x64xf32> -> vector<32x64xf32>
    %86 = arith.addf %79, %85 : vector<32x64xf32>
    %c2_91 = arith.constant 2 : index
    %c0_92 = arith.constant 0 : index
    %c0_93 = arith.constant 0 : index
    %87 = vector.load %arg4[%c2_91, %c0_92, %c0_93] : memref<3x1x64xf32, #tpu.memory_space<vmem>>, vector<1x1x64xf32>
    %88 = vector.shape_cast %87 : vector<1x1x64xf32> to vector<1x64xf32>
    %89 = vector.broadcast %88 : vector<1x64xf32> to vector<32x64xf32>
    %90 = arith.addf %86, %89 : vector<32x64xf32>
    %cst_94 = arith.constant 0.000000e+00 : f32
    %91 = vector.broadcast %cst_94 : f32 to vector<32x64xf32>
    %92 = arith.maximumf %90, %91 : vector<32x64xf32>
    %93 = arith.addf %64, %92 : vector<32x64xf32>
    %94 = vector.extract_strided_slice %93 {offsets = [0, 0], sizes = [16, 64], strides = [1, 1]} : vector<32x64xf32> to vector<16x64xf32>
    %95 = vector.extract_strided_slice %93 {offsets = [16, 0], sizes = [16, 64], strides = [1, 1]} : vector<32x64xf32> to vector<16x64xf32>
    %96 = arith.subf %94, %95 : vector<16x64xf32>
    %97 = math.absf %96 : vector<16x64xf32>
    %98 = arith.truncf %97 : vector<16x64xf32> to vector<16x64xbf16>
    %c0_95 = arith.constant 0 : index
    %c0_96 = arith.constant 0 : index
    %99 = vector.load %arg5[%c0_95, %c0_96] : memref<64x128xbf16, #tpu.memory_space<vmem>>, vector<64x128xbf16>
    %cst_97 = arith.constant dense<0.000000e+00> : vector<16x128xf32>
    %100 = tpu.matmul %98, %99, %cst_97 {dimension_numbers = #tpu.dot_dimension_numbers<[1], [0], [0], [1], [0, 0, 1, 1], [], []>} : vector<16x64xbf16>, vector<64x128xbf16>, vector<16x128xf32> -> vector<16x128xf32>
    %c0_98 = arith.constant 0 : index
    %c0_99 = arith.constant 0 : index
    %101 = vector.load %arg6[%c0_98, %c0_99] : memref<1x128xf32, #tpu.memory_space<vmem>>, vector<1x128xf32>
    %102 = vector.broadcast %101 : vector<1x128xf32> to vector<16x128xf32>
    %103 = arith.addf %100, %102 : vector<16x128xf32>
    %cst_100 = arith.constant 0.000000e+00 : f32
    %104 = vector.broadcast %cst_100 : f32 to vector<16x128xf32>
    %105 = arith.maximumf %103, %104 : vector<16x128xf32>
    %106 = vector.shape_cast %105 : vector<16x128xf32> to vector<1x16x128xf32>
    %c0_101 = arith.constant 0 : index
    %c0_102 = arith.constant 0 : index
    %c0_103 = arith.constant 0 : index
    %107 = vector.load %arg7[%c0_101, %c0_102, %c0_103] : memref<1x16x128xf32, #tpu.memory_space<vmem>>, vector<1x16x128xf32>
    tpu.vector_store %arg7[%c0_101, %c0_102, %c0_103], %106 {strides = array<i32>} : memref<1x16x128xf32, #tpu.memory_space<vmem>>, vector<1x16x128xf32>,
    return
  }
  func.func @transform_0(%arg0: i32) -> (i32, i32, i32) {
    %c0_i32 = arith.constant 0 : i32
    %c0_i32_0 = arith.constant 0 : i32
    %c0_i32_1 = arith.constant 0 : i32
    return %arg0, %c0_i32, %c0_i32_0 : i32, i32, i32
  }
  func.func @transform_1(%arg0: i32) -> (i32, i32, i32) {
    %c0_i32 = arith.constant 0 : i32
    %c0_i32_0 = arith.constant 0 : i32
    %c0_i32_1 = arith.constant 0 : i32
    return %arg0, %c0_i32, %c0_i32_0 : i32, i32, i32
  }
  func.func @transform_2(%arg0: i32) -> (i32, i32, i32) {
    %c0_i32 = arith.constant 0 : i32
    %c0_i32_0 = arith.constant 0 : i32
    %c0_i32_1 = arith.constant 0 : i32
    %c0_i32_2 = arith.constant 0 : i32
    return %c0_i32, %c0_i32_0, %c0_i32_1 : i32, i32, i32
  }
  func.func @transform_3(%arg0: i32) -> (i32, i32, i32) {
    %c0_i32 = arith.constant 0 : i32
    %c0_i32_0 = arith.constant 0 : i32
    %c0_i32_1 = arith.constant 0 : i32
    %c0_i32_2 = arith.constant 0 : i32
    return %c0_i32, %c0_i32_0, %c0_i32_1 : i32, i32, i32
  }
  func.func @transform_4(%arg0: i32) -> (i32, i32) {
    %c0_i32 = arith.constant 0 : i32
    %c0_i32_0 = arith.constant 0 : i32
    %c0_i32_1 = arith.constant 0 : i32
    return %c0_i32, %c0_i32_0 : i32, i32
  }
  func.func @transform_5(%arg0: i32) -> (i32, i32) {
    %c0_i32 = arith.constant 0 : i32
    %c0_i32_0 = arith.constant 0 : i32
    %c0_i32_1 = arith.constant 0 : i32
    return %c0_i32, %c0_i32_0 : i32, i32
  }
  func.func @transform_6(%arg0: i32) -> (i32, i32, i32) {
    %c0_i32 = arith.constant 0 : i32
    %c0_i32_0 = arith.constant 0 : i32
    %c0_i32_1 = arith.constant 0 : i32
    return %arg0, %c0_i32, %c0_i32_0 : i32, i32, i32
  }
}

</mosaic_0001>

<bundles_post_ra>
// kernel: tpu_custom_call.1
= control target key start
LH: loop header
LB: loop body
LE: loop exit
PB: predicated region body
PF: predicated region fallthrough
CT: control target
= control target key end

     0   :  { %11 = vsyncpa [#allocation4], 0  ;;  %s2510_s0 = inlined_call_operand.vmem [shape: f32[2,16,64], index: 0, kind: input, shape index: {}]   ;;  %s2511_s1 = inlined_call_operand.vmem [shape: f32[2,16,64], index: 1, kind: input, shape index: {}]   ;;  %s2512_s2 = inlined_call_operand.vmem [shape: bf16[9,72,64], index: 2, kind: input, shape index: {}]   ;;  %s2513_s3 = inlined_call_operand.vmem [shape: f32[3,1,64], index: 3, kind: input, shape index: {}]   ;;  %s2514_s4 = inlined_call_operand.vmem [shape: bf16[64,128], index: 4, kind: input, shape index: {}]   ;;  %s2515_s5 = inlined_call_operand.vmem [shape: f32[1,128], index: 5, kind: input, shape index: {}]   ;;  %s2516_s6 = inlined_call_operand.hbm [shape: f32[2,16,128], index: 6, kind: output, shape index: {}]  }
   0x1   :  { %13 = vsyncpa [#allocation4 + $0x1], 0  ;;  %s2116_s21 = smov 0   ;;  %s2118_s22 = smov 0  }
   0x2   :  { %s2120_s23 = smov 0   ;;  %s2122_s24 = smov 0  }
   0x3 LB: > { %s2137_s25 = sadd.s32 4294967295, %s2073_s24   ;;  %s1516_s26 = sadd.s32 4294967294, %s2073_s24   ;;  %s2073_s24 = sphi %s2122_s24, %s2522_s24   ;;  %s2069_s23 = sphi %s2120_s23, %s2521_s23   ;;  %s2065_s22 = sphi %s2118_s22, %s2520_s22   ;;  %s2061_s21 = sphi %s2116_s21, %s2519_s21  }
   0x4   : > { %s2141_s27 = sadd.s32 1, %s2073_s24   ;;  %s162_s28 = sadd.s32 1, %s2069_s23 }
   0x5   : > { %s159_s29 = ssub.s32 %s2073_s24, %s2141_s27  ;;  %p172_p0 = scmp.ne.s32.totalorder %s2069_s23, %s2065_s22 }
   0x6   : > { %p160_p1 = scmp.eq.s32.totalorder %s159_s29, 0  ;;  %p173_p2 = scmp.eq.s32.totalorder %s2137_s25, 1 }
   0x7   : > { %p178_p3 = scmp.ne.s32.totalorder %s2065_s22, %s2061_s21  ;;  %p179_p4 = scmp.eq.s32.totalorder %s1516_s26, 1 }
   0x8   : > { %s2152_s30 = scalar_select %p160_p1, %s2069_s23, %s162_s28  }
   0x9   : > { %p2154_p5 = por %p173_p2, %p172_p0  ;;  %p2158_p6 = por %p179_p4, %p178_p3 }
   0xa   : > { %p1519_p7 = scmp.ge.s32.totalorder %s2073_s24, 1  ;;  %p225_p8 = scmp.lt.s32.totalorder %s2073_s24, 3 }
   0xc   : > { %p226_p9 = pnand %p1519_p7, %p225_p8 }
   0xd   : > { %p260_p10 = scmp.lt.s32.totalorder (!%p226_p9), %s2137_s25, 1  ;;  %v1962_v0 = vld [vmem:[%s2512_s2] sm:$0xff] (!%p226_p9)   ;;  %vm271_vm0 = vcmask (!%p226_p9), 581632   ;;  %v1964_v2 = vld [vmem:[%s2512_s2 + $0x8] sm:$0xff] (!%p226_p9)   ;;  %v2075_v4 = vmov (!%p226_p9), 0.0   ;;  %vm276_vm1 = vcmask (!%p226_p9), 31744  }
   0xe   : > { %229 = sbr.rel (%p226_p9) target bundleno = 1418 (0x58a), region = 44  ;;  %v1963_v1 = vld [vmem:[%s2512_s2 + $0x24] sm:$0xff] (!%p226_p9)   ;;  %1761 = vmatprep.subr.bf16.mxu0 (!%p226_p9), %v1962_v0  ;;  %v1965_v3 = vld [vmem:[%s2512_s2 + $0x2c] sm:$0xff] (!%p226_p9)   ;;  %273 = vst.msk [vmem:[#allocation2 + $0x18] sm:$0x1] (!%p226_p9), %vm271_vm0, %v2075_v4  ;;  %vm284_vm2 = vcmask (!%p226_p9), 589344  }
   0xf   : > { %1747 = vmatprep.subr.bf16.mxu1 (!%p226_p9), %v1963_v1  ;;  %1762 = vmatpush3.bf16.msra.mxu0 (!%p226_p9), %v1962_v0  ;;  %272 = vst.msk [vmem:[#allocation2] sm:$0x1] (!%p226_p9), %vm271_vm0, %v2075_v4  ;;  %274 = vst.msk [vmem:[#allocation2 + $0x11] sm:$0x1] (!%p226_p9), %vm271_vm0, %v2075_v4  ;;  %v1966_v5 = vld [vmem:[%s2512_s2 + $0x10] sm:$0xff] (!%p226_p9)   ;;  %vm279_vm3 = vcmask (!%p226_p9), 25600  }
  0x10   : > { %275 = vst.msk [vmem:[#allocation2 + $0x29] sm:$0x1] (!%p226_p9), %vm271_vm0, %v2075_v4  ;;  %1748 = vmatpush3.bf16.msra.mxu1 (!%p226_p9), %v1963_v1  ;;  %1763 = vmatprep.subr.bf16.mxu0 (!%p226_p9), %v1964_v2  ;;  %vm287_vm4 = vcmask (!%p226_p9), 583200   ;;  %s2076_s12 = smov (!%p226_p9), 4   ;;  %v1967_v10 = vld [vmem:[%s2512_s2 + $0x34] sm:$0xff] (!%p226_p9)   ;;  %v1969_v12 = vld [vmem:[%s2512_s2 + $0x3c] sm:$0xff] (!%p226_p9)  }
  0x11   : > { %281 = vst.msk [vmem:[#allocation2 + $0x18] sm:$0xff] (!%p226_p9), %vm276_vm1, %v2075_v4  ;;  %282 = vst.msk [vmem:[#allocation2 + $0x20] sm:$0xff] (!%p226_p9), %vm276_vm1, %v2075_v4  ;;  %1749 = vmatprep.subr.bf16.mxu1 (!%p226_p9), %v1965_v3  ;;  %v1968_v11 = vld [vmem:[%s2512_s2 + $0x18] sm:$0xff] (!%p226_p9)   ;;  %v1970_v13 = vld [vmem:[%s2512_s2 + $0x20] ss:$0 sps:$4 sm:$0xff] (!%p226_p9)   ;;  %vm383_vm5 = vcmask (!%p226_p9), 1043456  }
  0x12   : > { %278 = vst.msk [vmem:[#allocation2 + $0x8] sm:$0xff] (!%p226_p9), %vm276_vm1, %v2075_v4  ;;  %277 = vst.msk [vmem:[#allocation2] sm:$0xff] (!%p226_p9), %vm276_vm1, %v2075_v4  ;;  %v1971_v14 = vld [vmem:[%s2512_s2 + $0x44] ss:$0 sps:$4 sm:$0xff] (!%p226_p9)   ;;  %v470_v15 = vsel (!%p226_p9), %vm383_vm5, %v1970_v13, 0  ;;  %v1972_v16 = vld [vmem:[%s2512_s2 + $0x48] sm:$0xff] (!%p226_p9)  }
  0x13   : > { %289 = vst.msk [vmem:[#allocation2 + $0x18] sm:$0xff] (!%p226_p9), %vm284_vm2, %v2075_v4  ;;  %290 = vst.msk [vmem:[#allocation2 + $0x20] sm:$0xff] (!%p226_p9), %vm284_vm2, %v2075_v4  ;;  %1764 = vmatpush3.bf16.msra.mxu0 (!%p226_p9), %v1964_v2  ;;  %v385_v17 = vsel (!%p226_p9), %vm383_vm5, %v1971_v14, 0  ;;  %vm302_vm6 = vcmask (!%p226_p9), 556064   ;;  %vm376_vm7 = vcmask (!%p226_p9), 588800   ;;  %v1973_v36 = vld [vmem:[%s2512_s2 + $0x50] sm:$0xff] (!%p226_p9)  }
  0x14   : > { %285 = vst.msk [vmem:[#allocation2] sm:$0xff] (!%p226_p9), %vm284_vm2, %v2075_v4  ;;  %286 = vst.msk [vmem:[#allocation2 + $0x8] sm:$0xff] (!%p226_p9), %vm284_vm2, %v2075_v4  ;;  %1750 = vmatpush3.bf16.msra.mxu1 (!%p226_p9), %v1965_v3  ;;  %1765 = vmatprep.subr.bf16.mxu0 (!%p226_p9), %v1966_v5  ;;  %v1974_v38 = vld [vmem:[%s2512_s2 + $0x58] sm:$0xff] (!%p226_p9)   ;;  %v1975_v39 = vld [vmem:[%s2512_s2 + $0x60] sm:$0xff] (!%p226_p9)   ;;  %vm2077_vm8 = vmmov (!%p226_p9), 0   ;;  %vm1379_vm9 = vcmask (!%p226_p9), 523264  }
  0x15   : > { %s261_s11 = scalar_select %p260_p10, %s2137_s25, 1  ;;  %283 = vst.msk [vmem:[#allocation2 + $0x28] sm:$0x3] %vm279_vm3, %v2075_v4  ;;  %280 = vst.msk [vmem:[#allocation2 + $0x10] sm:$0x3] %vm279_vm3, %v2075_v4  ;;  %1751 = vmatprep.subr.bf16.mxu1 %v1967_v10  ;;  %v1977_v45 = vld [vmem:[%s2512_s2 + $0x90] sm:$0xff]  }
  0x16   : > { %291 = vst.msk [vmem:[#allocation2 + $0x28] sm:$0x3] %vm287_vm4, %v2075_v4  ;;  %288 = vst.msk [vmem:[#allocation2 + $0x10] sm:$0x3] %vm287_vm4, %v2075_v4  ;;  %v1976_v40 = vld [vmem:[%s2512_s2 + $0x68] ss:$0 sps:$4 sm:$0xff]  }
  0x17   : > { %s1676_s16 = sshll.u32 %s261_s11, 4  ;;  %1766 = vmatpush3.bf16.msra.mxu0 %v1966_v5  ;;  %v571_v41 = vsel %vm383_vm5, %v1976_v40, 0  ;;  %v1978_v46 = vld [vmem:[%s2512_s2 + $0x98] sm:$0xff]   ;;  %v1979_v51 = vld [vmem:[%s2512_s2 + $0xa0] sm:$0xff]   ;;  %v1980_v56 = vld [vmem:[%s2512_s2 + $0xa8] sm:$0xff]   ;;  %s257_s26 = sand.u32 1, %s2065_s22  }
  0x18   : > { %s269_s29 = scalar_lea.vmem %s2511_s1, %s1676_s16  ;;  %s264_s11 = scalar_lea.vmem %s2510_s0, %s1676_s16  ;;  %1752 = vmatpush3.bf16.msra.mxu1 %v1967_v10  ;;  %1767 = vmatprep.subr.bf16.mxu0 %v1968_v11  ;;  %v1564_v54 = vld [vmem:[%s2513_s3] ss:$0 sm:$0xff]  ;;  %v1981_v57 = vld [vmem:[%s2512_s2 + $0xb0] ss:$0 sps:$4 sm:$0xff]  }
  0x19   : > { %v305_v6 = vld [vmem:[%s269_s29] sm:$0xff]  ;;  %v306_v8 = vld [vmem:[%s269_s29 + $0x8] sm:$0xff]  ;;  %1753 = vmatprep.subr.bf16.mxu1 %v1969_v12  ;;  %v727_v0 = vsel %vm383_vm5, %v1981_v57, 0  ;;  %s1520_s28 = sshll.u32 %s257_s26, 4  ;;  %s2469_s16 = scalar_lea.sflag [#allocation4], %s257_s26 }
  0x1a   : > { %v292_v7 = vld [vmem:[%s264_s11] sm:$0xff]  ;;  %309 = vrot.lane.b32.xlu1 %v305_v6, %s2076_s12  ;;  %v293_v9 = vld [vmem:[%s264_s11 + $0x8] sm:$0xff]  ;;  %s259_s9 = scalar_lea.vmem [#allocation3], %s1520_s28  ;;  %s1678_s11 = sshll.u32 %s2137_s25, 8 }
  0x1b   : > { %296 = vrot.lane.b32.xlu0 %v292_v7, %s2076_s12  ;;  %1768 = vmatpush3.bf16.msra.mxu0 %v1968_v11  ;;  %v1982_v5 = vld [vmem:[%s2512_s2 + $0x6c] sm:$0xff]   ;;  %s1442_s10 = sshll.u32 %s259_s9, 4  ;;  %s2467_s15 = scalar_lea.hbm %s2516_s6, %s1678_s11  ;;  %s2462_s10 = int_to_ptr.vmem [resolvable:$true] %s1442_s10 }
  0x1c   : > { %1754 = vmatpush3.bf16.msra.mxu1 %v1969_v12  ;;  %1910 = vmatprep.subr.msk.bf16.mxu0 %vm383_vm5, %v1970_v13  ;;  %s2011_s25 = scalar_lea.vmem %s2462_s10, 256  ;;  %s2078_s17 = smov [#allocation3]  }
  0x1d   : > { %1909 = vmatprep.subr.msk.bf16.mxu1 %vm383_vm5, %v1971_v14  ;;  %p2012_p11 = scmp.ne.s32.totalorder %s2462_s10, %s2011_s25  ;;  %s2015_s18 = sshll.u32 %s2078_s17, 4  ;;  %s2016_s18 = int_to_ptr.vmem [resolvable:$false] %s2015_s18 }
  0x1e   : > { %311 = vrot.lane.b32.xlu1 %v306_v8, %s2076_s12  ;;  %s2017_s19 = scalar_lea.vmem %s2016_s18, 512  ;;  %p2018_p0 = scmp.lt.s32.totalorder %s2462_s10, %s2016_s18 }
  0x1f   : > { %298 = vrot.lane.b32.xlu0 %v293_v9, %s2076_s12  ;;  %1770 = vmatpush3.bf16.msra.mxu0 %v470_v15  ;;  %p2013_p12 = pnand %p2012_p11, %p2154_p5  ;;  %p2019_p1 = scmp.lt.s32.totalorder %s2017_s19, %s2011_s25 }
  0x20   : > { %1756 = vmatpush3.bf16.msra.mxu1 %v385_v17  ;;  %1775 = vmatprep.subr.bf16.mxu0 %v1972_v16 }
  0x21   : > { %1789 = vmatprep.subr.bf16.mxu1 %v1977_v45  ;;  %p2014_p13 = pneg %p2013_p12  ;;  %p2020_p2 = por %p2019_p1, %p2018_p0 }
  0x23   : > { %p2021_p3 = pnand %p2020_p2, %p2014_p13 }
  0x8c   : > { %v310_v18 = vpop.permute.xlu1 %309 }
  0x8d   : > { %v297_v19 = vpop.permute.xlu0 %296  ;;  %316 = vst.msk [vmem:[#allocation2 + $0x19] sm:$0xff] %vm302_vm6, %v310_v18 }
  0x8e   : > { %303 = vst.msk [vmem:[#allocation2 + $0x1] sm:$0xff] %vm302_vm6, %v297_v19 }
  0x90   : > { %v312_v20 = vpop.permute.xlu1 %311 }
  0x91   : > { %v299_v21 = vpop.permute.xlu0 %298  ;;  %317 = vst.msk [vmem:[#allocation2 + $0x21] sm:$0xff] %vm302_vm6, %v312_v20 }
  0x92   : > { %304 = vst.msk [vmem:[#allocation2 + $0x9] sm:$0xff] %vm302_vm6, %v299_v21 }
  0x94   : > { %v335_v24 = vld [vmem:[#allocation2 + $0x19] sm:$0xff] }
  0x95   : > { %v333_v22 = vld [vmem:[#allocation2 + $0x1] sm:$0xff]  ;;  %v320_v25 = vld [vmem:[#allocation2 + $0x18] sm:$0xff] }
  0x96   : > { %v318_v23 = vld [vmem:[#allocation2] sm:$0xff] }
  0x98   : > { %v336_v28 = vld [vmem:[#allocation2 + $0x21] sm:$0xff] }
  0x99   : > { %v334_v26 = vld [vmem:[#allocation2 + $0x9] sm:$0xff]  ;;  %v338_v31 = vpack.c.bf16 %v336_v28, %v335_v24  ;;  %v321_v32 = vld [vmem:[#allocation2 + $0x20] sm:$0xff]  ;;  %v1987_v28 = vld [vmem:[%s2512_s2 + $0xb4] sm:$0xff]  }
  0x9a   : > { %v319_v27 = vld [vmem:[#allocation2 + $0x8] sm:$0xff]  ;;  %v337_v29 = vpack.c.bf16 %v334_v26, %v333_v22  ;;  %v323_v35 = vpack.c.bf16 %v321_v32, %v320_v25  ;;  %v523_v42 = vld [vmem:[#allocation2 + $0x1a] sm:$0xff] }
  0x9b   : > { %v322_v30 = vpack.c.bf16 %v319_v27, %v318_v23  ;;  %v521_v33 = vld [vmem:[#allocation2 + $0x2] sm:$0xff]  ;;  %v522_v34 = vld [vmem:[#allocation2 + $0xa] sm:$0xff]  ;;  %v1983_v22 = vld [vmem:[%s2512_s2 + $0x74] sm:$0xff]  }
  0x9c   : > { %1757 = vmatprep.mubr.msk.bf16.mxu1 %vm376_vm7, %v337_v29  ;;  %v525_v37 = vpack.c.bf16 %v522_v34, %v521_v33  ;;  %v524_v43 = vld [vmem:[#allocation2 + $0x22] sm:$0xff]  ;;  %v1986_v26 = vld [vmem:[%s2512_s2 + $0x8c] ss:$0 sps:$4 sm:$0xff]  }
  0x9d   : > { %1771 = vmatprep.mubr.msk.bf16.mxu0 %vm376_vm7, %v322_v30  ;;  %1758 = vmatmul.mubr.msk.bf16.vlgmr.msra.gmra.mrb[0].mxu1 %vm376_vm7, %v338_v31  ;;  %v526_v44 = vpack.c.bf16 %v524_v43, %v523_v42  ;;  %v1984_v24 = vld [vmem:[%s2512_s2 + $0x7c] sm:$0xff]   ;;  %v1985_v25 = vld [vmem:[%s2512_s2 + $0x84] sm:$0xff]   ;;  %v812_v27 = vsel %vm383_vm5, %v1986_v26, 0 }
  0x9e   : > { %1772 = vmatmul.mubr.msk.bf16.vlgmr.msra.gmra.mrb[0].mxu0 %vm376_vm7, %v323_v35  ;;  %1790 = vmatpush3.bf16.msra.mxu1 %v1977_v45  ;;  %v1988_v34 = vld [vmem:[%s2512_s2 + $0xbc] sm:$0xff]   ;;  %v1994_v45 = vld [vmem:[%s2512_s2 + $0x10c] sm:$0xff]  }
  0x9f   : > { %1776 = vmatpush3.bf16.msra.mxu0 %v1972_v16  ;;  %1785 = vmatprep.mubr.msk.bf16.mxu0 %vm376_vm7, %v525_v37  ;;  %v1990_v37 = vld [vmem:[%s2512_s2 + $0xcc] sm:$0xff]   ;;  %v1992_v43 = vld [vmem:[%s2512_s2 + $0xfc] sm:$0xff]  }
  0xa0   : > { %1777 = vmatprep.subr.bf16.mxu0 %v1973_v36  ;;  %1791 = vmatprep.subr.bf16.mxu1 %v1978_v46 }
  0xa2   : > { %1792 = vmatpush3.bf16.msra.mxu1 %v1978_v46  ;;  %v1614_v46 = vld [vmem:[%s2513_s3 + $0x1] ss:$0 sm:$0xff] }
  0xa3   : > { %1778 = vmatpush3.bf16.msra.mxu0 %v1973_v36  ;;  %1793 = vmatprep.subr.bf16.mxu1 %v1979_v51  ;;  %v1989_v36 = vld [vmem:[%s2512_s2 + $0xc4] sm:$0xff]  }
  0xa4   : > { %1779 = vmatprep.subr.bf16.mxu0 %v1974_v38 }
  0xa6   : > { %1794 = vmatpush3.bf16.msra.mxu1 %v1979_v51 }
  0xa7   : > { %1780 = vmatpush3.bf16.msra.mxu0 %v1974_v38  ;;  %1795 = vmatprep.subr.bf16.mxu1 %v1980_v56  ;;  %v1991_v38 = vld [vmem:[%s2512_s2 + $0xd4] ss:$0 sps:$4 sm:$0xff]  }
  0xa8   : > { %1781 = vmatprep.subr.bf16.mxu0 %v1975_v39 }
  0xaa   : > { %1796 = vmatpush3.bf16.msra.mxu1 %v1980_v56 }
  0xab   : > { %1782 = vmatpush3.bf16.msra.mxu0 %v1975_v39  ;;  %1912 = vmatprep.subr.msk.bf16.mxu1 %vm383_vm5, %v1981_v57  ;;  %v913_v39 = vsel %vm383_vm5, %v1991_v38, 0 }
  0xac   : > { %1911 = vmatprep.subr.msk.bf16.mxu0 %vm383_vm5, %v1976_v40 }
  0xae   : > { %1798 = vmatpush3.bf16.msra.mxu1 %v727_v0 }
  0xaf   : > { %1784 = vmatpush3.bf16.msra.mxu0 %v571_v41  ;;  %1803 = vmatprep.subr.bf16.mxu1 %v1982_v5 }
  0xb0   : > { %1831 = vmatprep.subr.bf16.mxu0 %v1992_v43 }
  0xb2   : > { %1786 = vmatmul.mubr.msk.bf16.vlgmr.msra.gmra.mrb[0].mxu0 %vm376_vm7, %v526_v44  ;;  %v1993_v44 = vld [vmem:[%s2512_s2 + $0x104] sm:$0xff]  }
  0xb3   : > { %1832 = vmatpush3.bf16.msra.mxu0 %v1992_v43 }
  0xb4   : > { %1833 = vmatprep.subr.bf16.mxu0 %v1993_v44 }
  0xb7   : > { %1834 = vmatpush3.bf16.msra.mxu0 %v1993_v44 }
  0xb8   : > { %1835 = vmatprep.subr.bf16.mxu0 %v1994_v45 }
  0xbb   : > { %1836 = vmatpush3.bf16.msra.mxu0 %v1994_v45 }
 0x170   : > { %v1759_v47 = vpop.f32.mrb[0].mxu1 }
 0x171   : > { %v421_v48 = vpop.f32.mrb[1].mxu1 }
 0x172   : > { %v1760_v49 = vpop.f32.mrb[2].mxu1 }
 0x173   : > { %v424_v50 = vpop.f32.mrb[3].mxu1 }
 0x185   : > { %v1787_v52 = vpop.f32.mrb[0].mxu0 }
 0x186   : > { %v1885_v53 = vadd.f32 %v1787_v52, %v1759_v47  ;;  %v607_v55 = vpop.f32.mrb[1].mxu0 }
 0x187   : > { %v1886_v58 = vadd.f32 %v607_v55, %v421_v48  ;;  %v1788_v59 = vpop.f32.mrb[2].mxu0  ;;  %v1995_v48 = vld [vmem:[%s2512_s2 + $0x114] sm:$0xff]  }
 0x188   : > { %v1887_v60 = vadd.f32 %v1788_v59, %v1760_v49  ;;  %v610_v61 = vpop.f32.mrb[3].mxu0  ;;  %v2279_v1 = vadd.f32 %v1885_v53, %v1564_v54  ;;  %1837 = vmatprep.subr.bf16.mxu0 %v1995_v48 }
 0x189   : > { %v2275_v62 = vadd.f32 %v1886_v58, %v1564_v54  ;;  %v1888_v63 = vadd.f32 %v610_v61, %v424_v50  ;;  %v1996_v50 = vld [vmem:[%s2512_s2 + $0x11c] ss:$0 sps:$4 sm:$0xff]   ;;  %1838 = vmatpush3.bf16.msra.mxu0 %v1995_v48 }
 0x18a   : > { %v2287_v6 = vadd.f32 %v1887_v60, %v1564_v54  ;;  %v639_v8 = vmax.f32 %v2279_v1, 0.0  ;;  %1915 = vmatprep.subr.msk.bf16.mxu0 %vm383_vm5, %v1996_v50  ;;  %v1074_v58 = vsel %vm383_vm5, %v1996_v50, 0 }
 0x18b   : > { %v637_v2 = vmax.f32 %v2275_v62, 0.0  ;;  %v2282_v3 = vadd.f32 %v1888_v63, %v1564_v54  ;;  %v1997_v63 = vld [vmem:[%s2512_s2 + $0xd8] sm:$0xff]  }
 0x18c   : > { %v640_v9 = vmax.f32 %v2287_v6, 0.0 }
 0x18d   : > { %v638_v7 = vmax.f32 %v2282_v3, 0.0  ;;  %645 = vrot.lane.b32.xlu0 %v637_v2, %s2076_s12  ;;  %1840 = vmatpush3.bf16.msra.mxu0 %v1074_v58 }
 0x18e   : > { %1845 = vmatprep.subr.bf16.mxu0 %v1997_v63 }
 0x18f   : > { %647 = vrot.lane.b32.xlu1 %v638_v7, %s2076_s12 }
 0x191   : > { %649 = vrot.lane.b32.xlu0 %v639_v8, %s2076_s12 }
 0x193   : > { %651 = vrot.lane.b32.xlu1 %v640_v9, %s2076_s12 }
 0x1ff   : > { %v646_v10 = vpop.permute.xlu0 %645 }
 0x200   : > { %657 = vst.msk [vmem:[#allocation2 + $0x1] sm:$0xff] %vm302_vm6, %v646_v10 }
 0x201   : > { %v648_v11 = vpop.permute.xlu1 %647 }
 0x202   : > { %658 = vst.msk [vmem:[#allocation2 + $0x9] sm:$0xff] %vm302_vm6, %v648_v11 }
 0x203   : > { %v650_v12 = vpop.permute.xlu0 %649 }
 0x204   : > { %659 = vst.msk [vmem:[#allocation2 + $0x19] sm:$0xff] %vm302_vm6, %v650_v12 }
 0x205   : > { %v652_v13 = vpop.permute.xlu1 %651 }
 0x206   : > { %660 = vst.msk [vmem:[#allocation2 + $0x21] sm:$0xff] %vm302_vm6, %v652_v13 }
 0x207   : > { %v677_v14 = vld [vmem:[#allocation2 + $0x1] sm:$0xff] }
 0x208   : > { %v661_v21 = vld [vmem:[#allocation2] sm:$0xff] }
 0x209   : > { %v678_v15 = vld [vmem:[#allocation2 + $0x9] sm:$0xff] }
 0x20a   : > { %v681_v16 = vpack.c.bf16 %v678_v15, %v677_v14  ;;  %v662_v17 = vld [vmem:[#allocation2 + $0x8] sm:$0xff] }
 0x20b   : > { %v679_v18 = vld [vmem:[#allocation2 + $0x19] sm:$0xff]  ;;  %v665_v23 = vpack.c.bf16 %v662_v17, %v661_v21  ;;  %v863_v30 = vld [vmem:[#allocation2 + $0x2] sm:$0xff]  ;;  %v864_v31 = vld [vmem:[#allocation2 + $0xa] sm:$0xff] }
 0x20c   : > { %1799 = vmatprep.mubr.msk.bf16.mxu1 %vm376_vm7, %v681_v16  ;;  %v663_v32 = vld [vmem:[#allocation2 + $0x18] sm:$0xff]  ;;  %v867_v35 = vpack.c.bf16 %v864_v31, %v863_v30  ;;  %v1998_v16 = vld [vmem:[%s2512_s2 + $0xe0] sm:$0xff]   ;;  %v2004_v30 = vld [vmem:[%s2512_s2 + $0x130] sm:$0xff]  }
 0x20d   : > { %v680_v19 = vld [vmem:[#allocation2 + $0x21] sm:$0xff]  ;;  %v2005_v31 = vld [vmem:[%s2512_s2 + $0x138] sm:$0xff]  }
 0x20e   : > { %v682_v20 = vpack.c.bf16 %v680_v19, %v679_v18  ;;  %v664_v29 = vld [vmem:[#allocation2 + $0x20] sm:$0xff]  ;;  %v1999_v18 = vld [vmem:[%s2512_s2 + $0xe8] sm:$0xff]   ;;  %v2000_v19 = vld [vmem:[%s2512_s2 + $0xf0] sm:$0xff]  }
 0x20f   : > { %v666_v33 = vpack.c.bf16 %v664_v29, %v663_v32  ;;  %v865_v40 = vld [vmem:[#allocation2 + $0x1a] sm:$0xff]  ;;  %v866_v41 = vld [vmem:[#allocation2 + $0x22] sm:$0xff] }
 0x210   : > { %1800 = vmatmul.mubr.msk.bf16.vlgmr.msra.gmra.mrb[4].mxu1 %vm376_vm7, %v682_v20  ;;  %v868_v42 = vpack.c.bf16 %v866_v41, %v865_v40  ;;  %v2001_v20 = vld [vmem:[%s2512_s2 + $0xf8] ss:$0 sps:$4 sm:$0xff]   ;;  %v2006_v32 = vld [vmem:[%s2512_s2 + $0x140] ss:$0 sps:$4 sm:$0xff]   ;;  %v1664_v41 = vld [vmem:[%s2513_s3 + $0x2] ss:$0 sm:$0xff] }
 0x211   : > { %1804 = vmatpush3.bf16.msra.mxu1 %v1982_v5  ;;  %1813 = vmatprep.mubr.msk.bf16.mxu1 %vm376_vm7, %v665_v23  ;;  %v1159_v21 = vsel %vm383_vm5, %v2001_v20, 0  ;;  %v2010_v40 = vld [vmem:[%s2514_s4 + $0x18] sm:$0xff]  }
 0x212   : > { %1805 = vmatprep.subr.bf16.mxu1 %v1983_v22 }
 0x215   : > { %1806 = vmatpush3.bf16.msra.mxu1 %v1983_v22  ;;  %v2002_v22 = vld [vmem:[%s2512_s2 + $0x120] sm:$0xff]  }
 0x216   : > { %1807 = vmatprep.subr.bf16.mxu1 %v1984_v24 }
 0x219   : > { %1808 = vmatpush3.bf16.msra.mxu1 %v1984_v24 }
 0x21a   : > { %1809 = vmatprep.subr.bf16.mxu1 %v1985_v25 }
 0x21d   : > { %1810 = vmatpush3.bf16.msra.mxu1 %v1985_v25 }
 0x21e   : > { %1913 = vmatprep.subr.msk.bf16.mxu1 %vm383_vm5, %v1986_v26 }
 0x221   : > { %1812 = vmatpush3.bf16.msra.mxu1 %v812_v27 }
 0x222   : > { %1817 = vmatprep.subr.bf16.mxu1 %v1987_v28 }
 0x224   : > { %1814 = vmatmul.mubr.msk.bf16.vlgmr.msra.gmra.mrb[4].mxu1 %vm376_vm7, %v666_v33  ;;  %v1260_v33 = vsel %vm383_vm5, %v2006_v32, 0 }
 0x225   : > { %1818 = vmatpush3.bf16.msra.mxu1 %v1987_v28  ;;  %1827 = vmatprep.mubr.msk.bf16.mxu1 %vm376_vm7, %v867_v35  ;;  %v2003_v28 = vld [vmem:[%s2512_s2 + $0x128] sm:$0xff]  }
 0x226   : > { %1819 = vmatprep.subr.bf16.mxu1 %v1988_v34 }
 0x229   : > { %1820 = vmatpush3.bf16.msra.mxu1 %v1988_v34 }
 0x22a   : > { %1821 = vmatprep.subr.bf16.mxu1 %v1989_v36 }
 0x22d   : > { %1822 = vmatpush3.bf16.msra.mxu1 %v1989_v36 }
 0x22e   : > { %1823 = vmatprep.subr.bf16.mxu1 %v1990_v37 }
 0x231   : > { %1824 = vmatpush3.bf16.msra.mxu1 %v1990_v37  ;;  %v2007_v37 = vld [vmem:[%s2514_s4] sm:$0xff]  }
 0x232   : > { %1914 = vmatprep.subr.msk.bf16.mxu1 %vm383_vm5, %v1991_v38  ;;  %v2008_v38 = vld [vmem:[%s2514_s4 + $0x8] sm:$0xff]  }
 0x235   : > { %1826 = vmatpush3.bf16.msra.mxu1 %v913_v39  ;;  %v2009_v39 = vld [vmem:[%s2514_s4 + $0x10] sm:$0xff]  }
 0x236   : > { %1873 = vmatprep.subr.bf16.mxu1 %v2075_v4 }
 0x238   : > { %1828 = vmatmul.mubr.msk.bf16.vlgmr.msra.gmra.mrb[4].mxu1 %vm376_vm7, %v868_v42 }
 0x239   : > { %1874 = vmatpush3.bf16.msra.mxu1 %v2007_v37  ;;  %1881 = vmatprep.mubr.msk.bf16.mxu1 %vm2077_vm8, %v2075_v4 }
 0x23a   : > { %1875 = vmatprep.subr.bf16.mxu1 %v2075_v4 }
 0x23d   : > { %1876 = vmatpush3.bf16.msra.mxu1 %v2008_v38 }
 0x23e   : > { %1877 = vmatprep.subr.bf16.mxu1 %v2075_v4 }
 0x241   : > { %1878 = vmatpush3.bf16.msra.mxu1 %v2009_v39 }
 0x242   : > { %1879 = vmatprep.subr.bf16.mxu1 %v2075_v4 }
 0x245   : > { %1880 = vmatpush3.bf16.msra.mxu1 %v2010_v40 }
 0x30b   : > { %v1829_v47 = vpop.f32.mrb[4].mxu1 }
 0x30c   : > { %v949_v49 = vpop.f32.mrb[5].mxu1  ;;  %v978_v51 = vadd.f32 %v1829_v47, %v1614_v46 }
 0x30d   : > { %v976_v52 = vadd.f32 %v1614_v46, %v949_v49  ;;  %v1830_v53 = vpop.f32.mrb[6].mxu1 }
 0x30e   : > { %v952_v54 = vpop.f32.mrb[7].mxu1  ;;  %v979_v56 = vadd.f32 %v1830_v53, %v1614_v46  ;;  %v982_v59 = vmax.f32 %v978_v51, 0.0 }
 0x30f   : > { %v980_v55 = vmax.f32 %v976_v52, 0.0  ;;  %v977_v57 = vadd.f32 %v1614_v46, %v952_v54 }
 0x310   : > { %v983_v0 = vmax.f32 %v979_v56, 0.0  ;;  %v2381_v62 = vadd.f32 %v982_v59, %v639_v8 }
 0x311   : > { %v2368_v60 = vadd.f32 %v980_v55, %v637_v2  ;;  %v981_v61 = vmax.f32 %v977_v57, 0.0 }
 0x312   : > { %v2387_v2 = vadd.f32 %v983_v0, %v640_v9  ;;  %v1665_v0 = vld [vmem:[%s2515_s5] ss:$0 sm:$0xff] }
 0x313   : > { %v2375_v5 = vadd.f32 %v981_v61, %v638_v7  ;;  %992 = vrot.lane.b32.xlu0 %v2368_v60, %s2076_s12 }
 0x315   : > { %994 = vrot.lane.b32.xlu1 %v2375_v5, %s2076_s12 }
 0x317   : > { %996 = vrot.lane.b32.xlu0 %v2381_v62, %s2076_s12 }
 0x319   : > { %998 = vrot.lane.b32.xlu1 %v2387_v2, %s2076_s12 }
 0x385   : > { %v993_v3 = vpop.permute.xlu0 %992 }
 0x386   : > { %1004 = vst.msk [vmem:[#allocation2 + $0x1] sm:$0xff] %vm302_vm6, %v993_v3 }
 0x387   : > { %v995_v7 = vpop.permute.xlu1 %994 }
 0x388   : > { %1005 = vst.msk [vmem:[#allocation2 + $0x9] sm:$0xff] %vm302_vm6, %v995_v7 }
 0x389   : > { %v997_v1 = vpop.permute.xlu0 %996 }
 0x38a   : > { %1006 = vst.msk [vmem:[#allocation2 + $0x19] sm:$0xff] %vm302_vm6, %v997_v1 }
 0x38b   : > { %v999_v8 = vpop.permute.xlu1 %998 }
 0x38c   : > { %1007 = vst.msk [vmem:[#allocation2 + $0x21] sm:$0xff] %vm302_vm6, %v999_v8 }
 0x38d   : > { %v1024_v6 = vld [vmem:[#allocation2 + $0x1] sm:$0xff] }
 0x38e   : > { %v1008_v15 = vld [vmem:[#allocation2] sm:$0xff] }
 0x38f   : > { %v1025_v9 = vld [vmem:[#allocation2 + $0x9] sm:$0xff] }
 0x390   : > { %v1028_v10 = vpack.c.bf16 %v1025_v9, %v1024_v6  ;;  %v1009_v11 = vld [vmem:[#allocation2 + $0x8] sm:$0xff] }
 0x391   : > { %v1026_v12 = vld [vmem:[#allocation2 + $0x19] sm:$0xff]  ;;  %v1012_v17 = vpack.c.bf16 %v1009_v11, %v1008_v15  ;;  %v1210_v24 = vld [vmem:[#allocation2 + $0x2] sm:$0xff]  ;;  %v1211_v25 = vld [vmem:[#allocation2 + $0xa] sm:$0xff] }
 0x392   : > { %1841 = vmatprep.mubr.msk.bf16.mxu0 %vm376_vm7, %v1028_v10  ;;  %v1010_v26 = vld [vmem:[#allocation2 + $0x18] sm:$0xff]  ;;  %v1214_v29 = vpack.c.bf16 %v1211_v25, %v1210_v24 }
 0x393   : > { %v1027_v13 = vld [vmem:[#allocation2 + $0x21] sm:$0xff] }
 0x394   : > { %v1029_v14 = vpack.c.bf16 %v1027_v13, %v1026_v12  ;;  %v1011_v23 = vld [vmem:[#allocation2 + $0x20] sm:$0xff] }
 0x395   : > { %v1013_v27 = vpack.c.bf16 %v1011_v23, %v1010_v26  ;;  %v1212_v34 = vld [vmem:[#allocation2 + $0x1a] sm:$0xff]  ;;  %v1213_v35 = vld [vmem:[#allocation2 + $0x22] sm:$0xff] }
 0x396   : > { %1842 = vmatmul.mubr.msk.bf16.vlgmr.msra.gmra.mrb[4].mxu0 %vm376_vm7, %v1029_v14  ;;  %v1215_v36 = vpack.c.bf16 %v1213_v35, %v1212_v34 }
 0x397   : > { %1846 = vmatpush3.bf16.msra.mxu0 %v1997_v63  ;;  %1855 = vmatprep.mubr.msk.bf16.mxu0 %vm376_vm7, %v1012_v17 }
 0x398   : > { %1847 = vmatprep.subr.bf16.mxu0 %v1998_v16 }
 0x39b   : > { %1848 = vmatpush3.bf16.msra.mxu0 %v1998_v16 }
 0x39c   : > { %1849 = vmatprep.subr.bf16.mxu0 %v1999_v18 }
 0x39f   : > { %1850 = vmatpush3.bf16.msra.mxu0 %v1999_v18 }
 0x3a0   : > { %1851 = vmatprep.subr.bf16.mxu0 %v2000_v19 }
 0x3a3   : > { %1852 = vmatpush3.bf16.msra.mxu0 %v2000_v19 }
 0x3a4   : > { %1916 = vmatprep.subr.msk.bf16.mxu0 %vm383_vm5, %v2001_v20 }
 0x3a7   : > { %1854 = vmatpush3.bf16.msra.mxu0 %v1159_v21 }
 0x3a8   : > { %1859 = vmatprep.subr.bf16.mxu0 %v2002_v22 }
 0x3aa   : > { %1856 = vmatmul.mubr.msk.bf16.vlgmr.msra.gmra.mrb[4].mxu0 %vm376_vm7, %v1013_v27 }
 0x3ab   : > { %1860 = vmatpush3.bf16.msra.mxu0 %v2002_v22  ;;  %1869 = vmatprep.mubr.msk.bf16.mxu0 %vm376_vm7, %v1214_v29 }
 0x3ac   : > { %1861 = vmatprep.subr.bf16.mxu0 %v2003_v28 }
 0x3af   : > { %1862 = vmatpush3.bf16.msra.mxu0 %v2003_v28 }
 0x3b0   : > { %1863 = vmatprep.subr.bf16.mxu0 %v2004_v30 }
 0x3b3   : > { %1864 = vmatpush3.bf16.msra.mxu0 %v2004_v30 }
 0x3b4   : > { %1865 = vmatprep.subr.bf16.mxu0 %v2005_v31 }
 0x3b7   : > { %1866 = vmatpush3.bf16.msra.mxu0 %v2005_v31 }
 0x3b8   : > { %1917 = vmatprep.subr.msk.bf16.mxu0 %vm383_vm5, %v2006_v32 }
 0x3bb   : > { %1868 = vmatpush3.bf16.msra.mxu0 %v1260_v33 }
 0x3be   : > { %1870 = vmatmul.mubr.msk.bf16.vlgmr.msra.gmra.mrb[4].mxu0 %vm376_vm7, %v1215_v36 }
 0x491   : > { %v1871_v42 = vpop.f32.mrb[4].mxu0 }
 0x492   : > { %v1325_v43 = vadd.f32 %v1871_v42, %v1664_v41  ;;  %v1296_v44 = vpop.f32.mrb[5].mxu0 }
 0x493   : > { %v1323_v45 = vadd.f32 %v1664_v41, %v1296_v44  ;;  %v1872_v46 = vpop.f32.mrb[6].mxu0 }
 0x494   : > { %v1329_v47 = vmax.f32 %v1325_v43, 0.0  ;;  %v1326_v48 = vadd.f32 %v1872_v46, %v1664_v41  ;;  %v1299_v49 = vpop.f32.mrb[7].mxu0 }
 0x495   : > { %v1327_v50 = vmax.f32 %v1323_v45, 0.0  ;;  %v1324_v51 = vadd.f32 %v1664_v41, %v1299_v49 }
 0x496   : > { %v1333_v52 = vadd.f32 %v1329_v47, %v2381_v62  ;;  %v1330_v53 = vmax.f32 %v1326_v48, 0.0 }
 0x497   : > { %v1331_v4 = vadd.f32 %v1327_v50, %v2368_v60  ;;  %v1328_v54 = vmax.f32 %v1324_v51, 0.0 }
 0x498   : > { %v1334_v55 = vadd.f32 %v1330_v53, %v2387_v2 }
 0x499   : > { %v1335_v56 = vsub.f32 %v1331_v4, %v1333_v52  ;;  %v1332_v57 = vadd.f32 %v1328_v54, %v2375_v5 }
 0x49b   : > { %v1336_v58 = vsub.f32 %v1332_v57, %v1334_v55  ;;  %v1337_v59 = vand.u32 2147483647, %v1335_v56 }
 0x49d   : > { %v1338_v61 = vand.u32 2147483647, %v1336_v58 }
 0x49f   : > { %v1339_v63 = vpack.c.bf16 %v1338_v61, %v1337_v59 }
 0x4a1   : > { %1882 = vmatmul.mubr.msk.bf16.vlgmr.msra.gmra.mrb[8].mxu1 %vm1379_vm9, %v1339_v63 }
 0x574   : > { %v1417_v60 = vpop.f32.mrb[8].mxu1 }
 0x575   : > { %v1418_v62 = vadd.f32 %v1665_v0, %v1417_v60  ;;  %v1883_v2 = vpop.f32.mrb[9].mxu1 }
 0x576   : > { %v1420_v5 = vpop.f32.mrb[10].mxu1 }
 0x577   : > { %v1424_v3 = vmax.f32 %v1418_v62, 0.0  ;;  %v1421_v7 = vadd.f32 %v1665_v0, %v1420_v5  ;;  %v1884_v1 = vpop.f32.mrb[11].mxu1 }
 0x579   : > { %1426 = vst [vmem:[%s259_s9] sm:$0xff] %v1424_v3  ;;  %v1425_v8 = vmax.f32 %v1421_v7, 0.0 }
 0x57b   : > { %1427 = vst [vmem:[%s259_s9 + $0x8] sm:$0xff] %v1425_v8 }
 0x57c   : > { %2024 = shalt.err (!%p2021_p3)
}
 0x57d   : > { %s2025_s20 = scalar_lea.hbm %s2467_s15, 256  ;;  %s2029_s12 = scalar_lea.hbm %s2516_s6, 512 }
 0x57e   : > { %p2026_p4 = scmp.ne.s32.totalorder %s2467_s15, %s2025_s20  ;;  %p2030_p9 = scmp.lt.u32.totalorder %s2467_s15, %s2516_s6 }
 0x57f   : > { %p2031_p10 = scmp.lt.u32.totalorder %s2029_s12, %s2025_s20  ;;  %p2033_p12 = scmp.lt.u32.totalorder %s2025_s20, %s2467_s15 }
 0x580   : > { %p2027_p7 = pnand %p2026_p4, %p2154_p5 }
 0x581   : > { %p2032_p11 = por %p2031_p10, %p2030_p9 }
 0x582   : > { %p2028_p8 = pneg %p2027_p7 }
 0x583   : > { %p2034_p13 = por %p2033_p12, %p2032_p11 }
 0x585   : > { %p2035_p0 = pnand %p2034_p13, %p2028_p8 }
 0x587   : > { %2038 = shalt.err (!%p2035_p0)
}
 0x588   : > { %s2079_s11 = smov 128   ;;  %s2080_s13 = smov 8  }
 0x589   : > { %1918 = dma.vmem_to_hbm [thread:$0]  (%p2154_p5), %s2462_s10, 256, %s2467_s15, %s2469_s16, %s2079_s11, %s2079_s11, %s2080_s13  }
 0x58a PF: > { %p1924_p1 = scmp.ge.s32.totalorder %s2073_s24, 2  ;;  %s1457_s14 = sand.u32 1, %s2061_s21  }
 0x58b   : > { %s1458_s25 = scalar_lea.sflag [#allocation4], %s1457_s14 }
 0x58c   : > { %p1921_p2 = pnand %p1924_p1, %p2158_p6 }
 0x58e   : > { %2056 = dma.done.wait (!%p1921_p2), %s1458_s25, 256  }
 0x58f   : > { %2058 = vsyncadd (!%p1921_p2), %s1458_s25, 4294967040  ;;  %p16_p3 = scmp.ge.s32.totalorder %s2141_s27, 4   ;;  %s2519_s21 = smov %s2065_s22 }
 0x590   : > { %s2520_s22 = smov %s2069_s23  ;;  %s2521_s23 = smov %s2152_s30 }
 0x591   : > { %s2522_s24 = smov %s2141_s27  ;;  %18 = sbr.rel (!%p16_p3) target bundleno = 3 (0x3), region = 93 }
 0x598   :  { %1463 = vsyncpa [#allocation4], 1 }
 0x599   :  { %1465 = vsyncpa [#allocation4 + $0x1], 1 }

</bundles_post_ra>
